<compile_context>
chip_gen: v7x
topology: tpu7x:2x2x1
jax: 0.10.0
libtpu: 0.0.40
codegen_flags: <defaults>
</compile_context>

<pallas_src>
import string

import jax
import jax.numpy as jnp
from jax.experimental import pallas as pl
from jax.experimental.pallas import tpu as pltpu


# ----------------------------- Pallas kernel --------------------------------
def _make_rnn_seq_kernel(hidden_size: int, n_categories: int, seq_len: int,
                         o_pad: int):
    H, O, T, Op = hidden_size, n_categories, seq_len, o_pad

    def rnn_seq_kernel(idx_ref,      # (T,) int32   SMEM scalar-prefetch
                       h0_ref,       # (1, H)       VMEM
                       wxb_ref,      # (I_pad, 1, H+Op) VMEM, resident row table (bias folded)
                       wh_ref,       # (H, H+Op)    VMEM, resident
                       out_ref,      # (T, 1, Op)   per-step log-probs
                       hfin_ref):    # (1, H)       final hidden
        # Loop-invariant category-lane mask (hoisted: JAX does not CSE broadcasts).
        lane = jax.lax.broadcasted_iota(jnp.int32, (1, Op), 1)
        valid = lane < O

        def step(t, h):
            # One-hot input == row gather; bias already folded into the row.
            x_row = wxb_ref[idx_ref[t]]                           # (1, H+Op)
            pre = x_row + jnp.dot(h, wh_ref[...],
                                  preferred_element_type=jnp.float32)
            new_h = pre[:, :H]                                    # lane-aligned slice
            logits = jnp.where(valid, pre[:, H:], -jnp.inf)       # mask padded lanes

            m = jnp.max(logits, axis=-1, keepdims=True)
            shifted = logits - m
            lse = jnp.log(jnp.sum(jnp.exp(shifted), axis=-1, keepdims=True))
            out_ref[t] = (shifted - lse).astype(out_ref.dtype)
            return new_h

        h_final = jax.lax.fori_loop(0, T, step, h0_ref[...], unroll=True)
        hfin_ref[...] = h_final.astype(hfin_ref.dtype)

    return rnn_seq_kernel


# ------------------------------- wrapper -------------------------------------
def rnn_sequence_forward(letter_idx, h0, w_i2h, b_i2h, w_i2o, b_i2o):
    """Run the RNN cell over a whole character sequence in one pallas_call.

    letter_idx: (T,) int32 one-hot positions of each character
    h0:         (1, H) initial hidden state
    w_i2h:      (I+H, H)  == torch i2h.weight.T
    b_i2h:      (1, H)
    w_i2o:      (I+H, O)  == torch i2o.weight.T
    b_i2o:      (1, O)
    returns (log_probs (T, 1, O), final_hidden (1, H))
    """
    T = letter_idx.shape[0]
    I_plus_H, H = w_i2h.shape
    O = w_i2o.shape[1]
    I = I_plus_H - H

    # One-time host/XLA-side prep (outside the recurrence).
    O_pad = pl.cdiv(O, 128) * 128
    Wide = H + O_pad

    w_full = jnp.zeros((I_plus_H, Wide), jnp.float32)
    w_full = w_full.at[:, :H].set(w_i2h)
    w_full = w_full.at[:, H:H + O].set(w_i2o)

    b = jnp.zeros((1, Wide), jnp.float32)
    b = b.at[:, :H].set(b_i2h)
    b = b.at[:, H:H + O].set(b_i2o)

    I_pad = pl.cdiv(I, 8) * 8
    w_xb = jnp.zeros((I_pad, 1, Wide), jnp.float32)
    w_xb = w_xb.at[:I, 0, :].set(w_full[:I] + b)   # fused bias folded into input rows
    w_h = w_full[I:]                               # (H, Wide), VMEM-resident

    kernel = _make_rnn_seq_kernel(H, O, T, O_pad)

    grid_spec = pltpu.PrefetchScalarGridSpec(
        num_scalar_prefetch=1,
        grid=(1,),
        in_specs=[
            pl.BlockSpec((1, H), lambda i, idx: (0, 0)),               # h0
            pl.BlockSpec((I_pad, 1, Wide), lambda i, idx: (0, 0, 0)),  # W_x + bias (resident)
            pl.BlockSpec((H, Wide), lambda i, idx: (0, 0)),            # W_h (resident)
        ],
        out_specs=[
            pl.BlockSpec((T, 1, O_pad), lambda i, idx: (0, 0, 0)),     # all log-probs
            pl.BlockSpec((1, H), lambda i, idx: (0, 0)),               # final hidden
        ],
    )

    logp_pad, h_final = pl.pallas_call(
        kernel,
        out_shape=(
            jax.ShapeDtypeStruct((T, 1, O_pad), jnp.float32),
            jax.ShapeDtypeStruct((1, H), jnp.float32),
        ),
        grid_spec=grid_spec,
        compiler_params=pltpu.CompilerParams(
            dimension_semantics=("arbitrary",)),  # recurrent (serial) axis
    )(letter_idx, h0, w_xb, w_h)

    return logp_pad[:, :, :O], h_final


# ------------------------------- reference ----------------------------------
def rnn_sequence_ref(letter_idx, h0, w_i2h, b_i2h, w_i2o, b_i2o, n_letters):
    def step(h, idx):
        x = jax.nn.one_hot(idx, n_letters, dtype=jnp.float32)[None, :]
        comb = jnp.concatenate([x, h], axis=1)
        new_h = comb @ w_i2h + b_i2h
        logits = comb @ w_i2o + b_i2o
        out = jax.nn.log_softmax(logits, axis=1)
        return new_h, out

    h_final, outs = jax.lax.scan(step, h0, letter_idx)
    return outs, h_final


# --------------------------------- main --------------------------------------
if __name__ == "__main__":
    all_letters = string.ascii_letters + " .,;'"
    n_letters = len(all_letters)      # 57
    n_hidden = 128
    n_categories = 18                 # typical name-classification category count

    name = "Albert"                   # input = lineToTensor('Albert')
    letter_idx = jnp.array([all_letters.find(c) for c in name], jnp.int32)

    key = jax.random.PRNGKey(0)
    k1, k2, k3, k4 = jax.random.split(key, 4)

    in_feats = n_letters + n_hidden
    bound = 1.0 / (in_feats ** 0.5)   # PyTorch-Linear-like U(-1/sqrt(fan_in), ...)
    w_i2h = jax.random.uniform(k1, (in_feats, n_hidden), jnp.float32, -bound, bound)
    b_i2h = jax.random.uniform(k2, (1, n_hidden), jnp.float32, -bound, bound)
    w_i2o = jax.random.uniform(k3, (in_feats, n_categories), jnp.float32, -bound, bound)
    b_i2o = jax.random.uniform(k4, (1, n_categories), jnp.float32, -bound, bound)

    h0 = jnp.zeros((1, n_hidden), jnp.float32)   # initHidden()

    log_probs, h_final = rnn_sequence_forward(
        letter_idx, h0, w_i2h, b_i2h, w_i2o, b_i2o)
    log_probs = jax.block_until_ready(log_probs)
    h_final = jax.block_until_ready(h_final)

    log_probs_ref, h_final_ref = rnn_sequence_ref(
        letter_idx, h0, w_i2h, b_i2h, w_i2o, b_i2o, n_letters)

    assert jnp.allclose(log_probs, log_probs_ref, atol=1e-4, rtol=1e-4), \
        "log-softmax output mismatch"
    assert jnp.allclose(h_final, h_final_ref, atol=1e-4, rtol=1e-4), \
        "hidden output mismatch"

    print("KERNEL_OK")
</pallas_src>

<mosaic_0001>
module attributes {stable_mosaic.version = 11 : i64} {
  func.func @rnn_seq_kernel(%arg0: i32, %arg1: memref<6xi32, #tpu.memory_space<smem>>, %arg2: memref<1x128xf32, #tpu.memory_space<vmem>>, %arg3: memref<64x1x256xf32, #tpu.memory_space<vmem>>, %arg4: memref<128x256xf32, #tpu.memory_space<vmem>>, %arg5: memref<6x1x128xf32, #tpu.memory_space<vmem>>, %arg6: memref<1x128xf32, #tpu.memory_space<vmem>>) attributes {dimension_semantics = [#tpu.dimension_semantics<arbitrary>], iteration_bounds = array<i64: 1>, scalar_prefetch = 1 : i64, scratch_operands = 0 : i64, tpu.core_type = #tpu.core_type<tc>, window_params = [{pipeline_mode = #tpu.pipeline_mode<synchronous>, transform_indices = @transform_0, window_bounds = array<i64: 1, 128>}, {pipeline_mode = #tpu.pipeline_mode<synchronous>, transform_indices = @transform_1, window_bounds = array<i64: 64, 1, 256>}, {pipeline_mode = #tpu.pipeline_mode<synchronous>, transform_indices = @transform_2, window_bounds = array<i64: 128, 256>}, {pipeline_mode = #tpu.pipeline_mode<synchronous>, transform_indices = @transform_3, window_bounds = array<i64: 6, 1, 128>}, {pipeline_mode = #tpu.pipeline_mode<synchronous>, transform_indices = @transform_4, window_bounds = array<i64: 1, 128>}]} {
    %0 = tpu.iota {dimensions = array<i32: 1>} : vector<1x128xi32>
    %c18_i32 = arith.constant 18 : i32
    %1 = vector.broadcast %c18_i32 : i32 to vector<1x128xi32>
    %2 = arith.cmpi slt, %0, %1 : vector<1x128xi32>
    %c0 = arith.constant 0 : index
    %c0_0 = arith.constant 0 : index
    %3 = vector.load %arg2[%c0, %c0_0] : memref<1x128xf32, #tpu.memory_space<vmem>>, vector<1x128xf32>
    %c0_i32 = arith.constant 0 : i32
    %4 = arith.index_cast %c0_i32 : i32 to index
    %5 = memref.load %arg1[%4] : memref<6xi32, #tpu.memory_space<smem>>
    %6 = arith.index_cast %5 : i32 to index
    %c0_1 = arith.constant 0 : index
    %c0_2 = arith.constant 0 : index
    %7 = vector.load %arg3[%6, %c0_1, %c0_2] : memref<64x1x256xf32, #tpu.memory_space<vmem>>, vector<1x1x256xf32>
    %8 = vector.shape_cast %7 : vector<1x1x256xf32> to vector<1x256xf32>
    %c0_3 = arith.constant 0 : index
    %c0_4 = arith.constant 0 : index
    %9 = vector.load %arg4[%c0_3, %c0_4] : memref<128x256xf32, #tpu.memory_space<vmem>>, vector<128x256xf32>
    %cst = arith.constant dense<0.000000e+00> : vector<1x256xf32>
    %10 = tpu.matmul %3, %9, %cst {dimension_numbers = #tpu.dot_dimension_numbers<[1], [0], [0], [1], [0, 0, 1, 1], [], []>} : vector<1x128xf32>, vector<128x256xf32>, vector<1x256xf32> -> vector<1x256xf32>
    %11 = arith.addf %8, %10 : vector<1x256xf32>
    %12 = vector.extract_strided_slice %11 {offsets = [0, 0], sizes = [1, 128], strides = [1, 1]} : vector<1x256xf32> to vector<1x128xf32>
    %13 = vector.extract_strided_slice %11 {offsets = [0, 128], sizes = [1, 128], strides = [1, 1]} : vector<1x256xf32> to vector<1x128xf32>
    %cst_5 = arith.constant 0xFF800000 : f32
    %14 = vector.broadcast %cst_5 : f32 to vector<1x128xf32>
    %15 = arith.select %2, %13, %14 : vector<1x128xi1>, vector<1x128xf32>
    %cst_6 = arith.constant dense<0xFF800000> : vector<1xf32>
    %16 = vector.multi_reduction <maximumf>, %15, %cst_6 [1] : vector<1x128xf32> to vector<1xf32>
    %17 = vector.shape_cast %16 : vector<1xf32> to vector<1x1xf32>
    %18 = vector.broadcast %17 : vector<1x1xf32> to vector<1x128xf32>
    %19 = arith.subf %15, %18 : vector<1x128xf32>
    %20 = math.exp %19 : vector<1x128xf32>
    %cst_7 = arith.constant dense<0.000000e+00> : vector<1xf32>
    %21 = vector.multi_reduction <add>, %20, %cst_7 [1] : vector<1x128xf32> to vector<1xf32>
    %22 = vector.shape_cast %21 : vector<1xf32> to vector<1x1xf32>
    %23 = math.log %22 : vector<1x1xf32>
    %24 = vector.broadcast %23 : vector<1x1xf32> to vector<1x128xf32>
    %25 = arith.subf %19, %24 : vector<1x128xf32>
    %26 = arith.index_cast %c0_i32 : i32 to index
    %c0_8 = arith.constant 0 : index
    %c0_9 = arith.constant 0 : index
    %27 = vector.load %arg5[%26, %c0_8, %c0_9] : memref<6x1x128xf32, #tpu.memory_space<vmem>>, vector<1x1x128xf32>
    %28 = vector.shape_cast %27 : vector<1x1x128xf32> to vector<1x128xf32>
    %29 = vector.shape_cast %25 : vector<1x128xf32> to vector<1x1x128xf32>
    tpu.vector_store %arg5[%26, %c0_8, %c0_9], %29 {strides = array<i32>} : memref<6x1x128xf32, #tpu.memory_space<vmem>>, vector<1x1x128xf32>,
    %c1_i32 = arith.constant 1 : i32
    %30 = arith.index_cast %c1_i32 : i32 to index
    %31 = memref.load %arg1[%30] : memref<6xi32, #tpu.memory_space<smem>>
    %32 = arith.index_cast %31 : i32 to index
    %c0_10 = arith.constant 0 : index
    %c0_11 = arith.constant 0 : index
    %33 = vector.load %arg3[%32, %c0_10, %c0_11] : memref<64x1x256xf32, #tpu.memory_space<vmem>>, vector<1x1x256xf32>
    %34 = vector.shape_cast %33 : vector<1x1x256xf32> to vector<1x256xf32>
    %c0_12 = arith.constant 0 : index
    %c0_13 = arith.constant 0 : index
    %35 = vector.load %arg4[%c0_12, %c0_13] : memref<128x256xf32, #tpu.memory_space<vmem>>, vector<128x256xf32>
    %cst_14 = arith.constant dense<0.000000e+00> : vector<1x256xf32>
    %36 = tpu.matmul %12, %35, %cst_14 {dimension_numbers = #tpu.dot_dimension_numbers<[1], [0], [0], [1], [0, 0, 1, 1], [], []>} : vector<1x128xf32>, vector<128x256xf32>, vector<1x256xf32> -> vector<1x256xf32>
    %37 = arith.addf %34, %36 : vector<1x256xf32>
    %38 = vector.extract_strided_slice %37 {offsets = [0, 0], sizes = [1, 128], strides = [1, 1]} : vector<1x256xf32> to vector<1x128xf32>
    %39 = vector.extract_strided_slice %37 {offsets = [0, 128], sizes = [1, 128], strides = [1, 1]} : vector<1x256xf32> to vector<1x128xf32>
    %cst_15 = arith.constant 0xFF800000 : f32
    %40 = vector.broadcast %cst_15 : f32 to vector<1x128xf32>
    %41 = arith.select %2, %39, %40 : vector<1x128xi1>, vector<1x128xf32>
    %cst_16 = arith.constant dense<0xFF800000> : vector<1xf32>
    %42 = vector.multi_reduction <maximumf>, %41, %cst_16 [1] : vector<1x128xf32> to vector<1xf32>
    %43 = vector.shape_cast %42 : vector<1xf32> to vector<1x1xf32>
    %44 = vector.broadcast %43 : vector<1x1xf32> to vector<1x128xf32>
    %45 = arith.subf %41, %44 : vector<1x128xf32>
    %46 = math.exp %45 : vector<1x128xf32>
    %cst_17 = arith.constant dense<0.000000e+00> : vector<1xf32>
    %47 = vector.multi_reduction <add>, %46, %cst_17 [1] : vector<1x128xf32> to vector<1xf32>
    %48 = vector.shape_cast %47 : vector<1xf32> to vector<1x1xf32>
    %49 = math.log %48 : vector<1x1xf32>
    %50 = vector.broadcast %49 : vector<1x1xf32> to vector<1x128xf32>
    %51 = arith.subf %45, %50 : vector<1x128xf32>
    %52 = arith.index_cast %c1_i32 : i32 to index
    %c0_18 = arith.constant 0 : index
    %c0_19 = arith.constant 0 : index
    %53 = vector.load %arg5[%52, %c0_18, %c0_19] : memref<6x1x128xf32, #tpu.memory_space<vmem>>, vector<1x1x128xf32>
    %54 = vector.shape_cast %53 : vector<1x1x128xf32> to vector<1x128xf32>
    %55 = vector.shape_cast %51 : vector<1x128xf32> to vector<1x1x128xf32>
    tpu.vector_store %arg5[%52, %c0_18, %c0_19], %55 {strides = array<i32>} : memref<6x1x128xf32, #tpu.memory_space<vmem>>, vector<1x1x128xf32>,
    %c2_i32 = arith.constant 2 : i32
    %56 = arith.index_cast %c2_i32 : i32 to index
    %57 = memref.load %arg1[%56] : memref<6xi32, #tpu.memory_space<smem>>
    %58 = arith.index_cast %57 : i32 to index
    %c0_20 = arith.constant 0 : index
    %c0_21 = arith.constant 0 : index
    %59 = vector.load %arg3[%58, %c0_20, %c0_21] : memref<64x1x256xf32, #tpu.memory_space<vmem>>, vector<1x1x256xf32>
    %60 = vector.shape_cast %59 : vector<1x1x256xf32> to vector<1x256xf32>
    %c0_22 = arith.constant 0 : index
    %c0_23 = arith.constant 0 : index
    %61 = vector.load %arg4[%c0_22, %c0_23] : memref<128x256xf32, #tpu.memory_space<vmem>>, vector<128x256xf32>
    %cst_24 = arith.constant dense<0.000000e+00> : vector<1x256xf32>
    %62 = tpu.matmul %38, %61, %cst_24 {dimension_numbers = #tpu.dot_dimension_numbers<[1], [0], [0], [1], [0, 0, 1, 1], [], []>} : vector<1x128xf32>, vector<128x256xf32>, vector<1x256xf32> -> vector<1x256xf32>
    %63 = arith.addf %60, %62 : vector<1x256xf32>
    %64 = vector.extract_strided_slice %63 {offsets = [0, 0], sizes = [1, 128], strides = [1, 1]} : vector<1x256xf32> to vector<1x128xf32>
    %65 = vector.extract_strided_slice %63 {offsets = [0, 128], sizes = [1, 128], strides = [1, 1]} : vector<1x256xf32> to vector<1x128xf32>
    %cst_25 = arith.constant 0xFF800000 : f32
    %66 = vector.broadcast %cst_25 : f32 to vector<1x128xf32>
    %67 = arith.select %2, %65, %66 : vector<1x128xi1>, vector<1x128xf32>
    %cst_26 = arith.constant dense<0xFF800000> : vector<1xf32>
    %68 = vector.multi_reduction <maximumf>, %67, %cst_26 [1] : vector<1x128xf32> to vector<1xf32>
    %69 = vector.shape_cast %68 : vector<1xf32> to vector<1x1xf32>
    %70 = vector.broadcast %69 : vector<1x1xf32> to vector<1x128xf32>
    %71 = arith.subf %67, %70 : vector<1x128xf32>
    %72 = math.exp %71 : vector<1x128xf32>
    %cst_27 = arith.constant dense<0.000000e+00> : vector<1xf32>
    %73 = vector.multi_reduction <add>, %72, %cst_27 [1] : vector<1x128xf32> to vector<1xf32>
    %74 = vector.shape_cast %73 : vector<1xf32> to vector<1x1xf32>
    %75 = math.log %74 : vector<1x1xf32>
    %76 = vector.broadcast %75 : vector<1x1xf32> to vector<1x128xf32>
    %77 = arith.subf %71, %76 : vector<1x128xf32>
    %78 = arith.index_cast %c2_i32 : i32 to index
    %c0_28 = arith.constant 0 : index
    %c0_29 = arith.constant 0 : index
    %79 = vector.load %arg5[%78, %c0_28, %c0_29] : memref<6x1x128xf32, #tpu.memory_space<vmem>>, vector<1x1x128xf32>
    %80 = vector.shape_cast %79 : vector<1x1x128xf32> to vector<1x128xf32>
    %81 = vector.shape_cast %77 : vector<1x128xf32> to vector<1x1x128xf32>
    tpu.vector_store %arg5[%78, %c0_28, %c0_29], %81 {strides = array<i32>} : memref<6x1x128xf32, #tpu.memory_space<vmem>>, vector<1x1x128xf32>,
    %c3_i32 = arith.constant 3 : i32
    %82 = arith.index_cast %c3_i32 : i32 to index
    %83 = memref.load %arg1[%82] : memref<6xi32, #tpu.memory_space<smem>>
    %84 = arith.index_cast %83 : i32 to index
    %c0_30 = arith.constant 0 : index
    %c0_31 = arith.constant 0 : index
    %85 = vector.load %arg3[%84, %c0_30, %c0_31] : memref<64x1x256xf32, #tpu.memory_space<vmem>>, vector<1x1x256xf32>
    %86 = vector.shape_cast %85 : vector<1x1x256xf32> to vector<1x256xf32>
    %c0_32 = arith.constant 0 : index
    %c0_33 = arith.constant 0 : index
    %87 = vector.load %arg4[%c0_32, %c0_33] : memref<128x256xf32, #tpu.memory_space<vmem>>, vector<128x256xf32>
    %cst_34 = arith.constant dense<0.000000e+00> : vector<1x256xf32>
    %88 = tpu.matmul %64, %87, %cst_34 {dimension_numbers = #tpu.dot_dimension_numbers<[1], [0], [0], [1], [0, 0, 1, 1], [], []>} : vector<1x128xf32>, vector<128x256xf32>, vector<1x256xf32> -> vector<1x256xf32>
    %89 = arith.addf %86, %88 : vector<1x256xf32>
    %90 = vector.extract_strided_slice %89 {offsets = [0, 0], sizes = [1, 128], strides = [1, 1]} : vector<1x256xf32> to vector<1x128xf32>
    %91 = vector.extract_strided_slice %89 {offsets = [0, 128], sizes = [1, 128], strides = [1, 1]} : vector<1x256xf32> to vector<1x128xf32>
    %cst_35 = arith.constant 0xFF800000 : f32
    %92 = vector.broadcast %cst_35 : f32 to vector<1x128xf32>
    %93 = arith.select %2, %91, %92 : vector<1x128xi1>, vector<1x128xf32>
    %cst_36 = arith.constant dense<0xFF800000> : vector<1xf32>
    %94 = vector.multi_reduction <maximumf>, %93, %cst_36 [1] : vector<1x128xf32> to vector<1xf32>
    %95 = vector.shape_cast %94 : vector<1xf32> to vector<1x1xf32>
    %96 = vector.broadcast %95 : vector<1x1xf32> to vector<1x128xf32>
    %97 = arith.subf %93, %96 : vector<1x128xf32>
    %98 = math.exp %97 : vector<1x128xf32>
    %cst_37 = arith.constant dense<0.000000e+00> : vector<1xf32>
    %99 = vector.multi_reduction <add>, %98, %cst_37 [1] : vector<1x128xf32> to vector<1xf32>
    %100 = vector.shape_cast %99 : vector<1xf32> to vector<1x1xf32>
    %101 = math.log %100 : vector<1x1xf32>
    %102 = vector.broadcast %101 : vector<1x1xf32> to vector<1x128xf32>
    %103 = arith.subf %97, %102 : vector<1x128xf32>
    %104 = arith.index_cast %c3_i32 : i32 to index
    %c0_38 = arith.constant 0 : index
    %c0_39 = arith.constant 0 : index
    %105 = vector.load %arg5[%104, %c0_38, %c0_39] : memref<6x1x128xf32, #tpu.memory_space<vmem>>, vector<1x1x128xf32>
    %106 = vector.shape_cast %105 : vector<1x1x128xf32> to vector<1x128xf32>
    %107 = vector.shape_cast %103 : vector<1x128xf32> to vector<1x1x128xf32>
    tpu.vector_store %arg5[%104, %c0_38, %c0_39], %107 {strides = array<i32>} : memref<6x1x128xf32, #tpu.memory_space<vmem>>, vector<1x1x128xf32>,
    %c4_i32 = arith.constant 4 : i32
    %108 = arith.index_cast %c4_i32 : i32 to index
    %109 = memref.load %arg1[%108] : memref<6xi32, #tpu.memory_space<smem>>
    %110 = arith.index_cast %109 : i32 to index
    %c0_40 = arith.constant 0 : index
    %c0_41 = arith.constant 0 : index
    %111 = vector.load %arg3[%110, %c0_40, %c0_41] : memref<64x1x256xf32, #tpu.memory_space<vmem>>, vector<1x1x256xf32>
    %112 = vector.shape_cast %111 : vector<1x1x256xf32> to vector<1x256xf32>
    %c0_42 = arith.constant 0 : index
    %c0_43 = arith.constant 0 : index
    %113 = vector.load %arg4[%c0_42, %c0_43] : memref<128x256xf32, #tpu.memory_space<vmem>>, vector<128x256xf32>
    %cst_44 = arith.constant dense<0.000000e+00> : vector<1x256xf32>
    %114 = tpu.matmul %90, %113, %cst_44 {dimension_numbers = #tpu.dot_dimension_numbers<[1], [0], [0], [1], [0, 0, 1, 1], [], []>} : vector<1x128xf32>, vector<128x256xf32>, vector<1x256xf32> -> vector<1x256xf32>
    %115 = arith.addf %112, %114 : vector<1x256xf32>
    %116 = vector.extract_strided_slice %115 {offsets = [0, 0], sizes = [1, 128], strides = [1, 1]} : vector<1x256xf32> to vector<1x128xf32>
    %117 = vector.extract_strided_slice %115 {offsets = [0, 128], sizes = [1, 128], strides = [1, 1]} : vector<1x256xf32> to vector<1x128xf32>
    %cst_45 = arith.constant 0xFF800000 : f32
    %118 = vector.broadcast %cst_45 : f32 to vector<1x128xf32>
    %119 = arith.select %2, %117, %118 : vector<1x128xi1>, vector<1x128xf32>
    %cst_46 = arith.constant dense<0xFF800000> : vector<1xf32>
    %120 = vector.multi_reduction <maximumf>, %119, %cst_46 [1] : vector<1x128xf32> to vector<1xf32>
    %121 = vector.shape_cast %120 : vector<1xf32> to vector<1x1xf32>
    %122 = vector.broadcast %121 : vector<1x1xf32> to vector<1x128xf32>
    %123 = arith.subf %119, %122 : vector<1x128xf32>
    %124 = math.exp %123 : vector<1x128xf32>
    %cst_47 = arith.constant dense<0.000000e+00> : vector<1xf32>
    %125 = vector.multi_reduction <add>, %124, %cst_47 [1] : vector<1x128xf32> to vector<1xf32>
    %126 = vector.shape_cast %125 : vector<1xf32> to vector<1x1xf32>
    %127 = math.log %126 : vector<1x1xf32>
    %128 = vector.broadcast %127 : vector<1x1xf32> to vector<1x128xf32>
    %129 = arith.subf %123, %128 : vector<1x128xf32>
    %130 = arith.index_cast %c4_i32 : i32 to index
    %c0_48 = arith.constant 0 : index
    %c0_49 = arith.constant 0 : index
    %131 = vector.load %arg5[%130, %c0_48, %c0_49] : memref<6x1x128xf32, #tpu.memory_space<vmem>>, vector<1x1x128xf32>
    %132 = vector.shape_cast %131 : vector<1x1x128xf32> to vector<1x128xf32>
    %133 = vector.shape_cast %129 : vector<1x128xf32> to vector<1x1x128xf32>
    tpu.vector_store %arg5[%130, %c0_48, %c0_49], %133 {strides = array<i32>} : memref<6x1x128xf32, #tpu.memory_space<vmem>>, vector<1x1x128xf32>,
    %c5_i32 = arith.constant 5 : i32
    %134 = arith.index_cast %c5_i32 : i32 to index
    %135 = memref.load %arg1[%134] : memref<6xi32, #tpu.memory_space<smem>>
    %136 = arith.index_cast %135 : i32 to index
    %c0_50 = arith.constant 0 : index
    %c0_51 = arith.constant 0 : index
    %137 = vector.load %arg3[%136, %c0_50, %c0_51] : memref<64x1x256xf32, #tpu.memory_space<vmem>>, vector<1x1x256xf32>
    %138 = vector.shape_cast %137 : vector<1x1x256xf32> to vector<1x256xf32>
    %c0_52 = arith.constant 0 : index
    %c0_53 = arith.constant 0 : index
    %139 = vector.load %arg4[%c0_52, %c0_53] : memref<128x256xf32, #tpu.memory_space<vmem>>, vector<128x256xf32>
    %cst_54 = arith.constant dense<0.000000e+00> : vector<1x256xf32>
    %140 = tpu.matmul %116, %139, %cst_54 {dimension_numbers = #tpu.dot_dimension_numbers<[1], [0], [0], [1], [0, 0, 1, 1], [], []>} : vector<1x128xf32>, vector<128x256xf32>, vector<1x256xf32> -> vector<1x256xf32>
    %141 = arith.addf %138, %140 : vector<1x256xf32>
    %142 = vector.extract_strided_slice %141 {offsets = [0, 0], sizes = [1, 128], strides = [1, 1]} : vector<1x256xf32> to vector<1x128xf32>
    %143 = vector.extract_strided_slice %141 {offsets = [0, 128], sizes = [1, 128], strides = [1, 1]} : vector<1x256xf32> to vector<1x128xf32>
    %cst_55 = arith.constant 0xFF800000 : f32
    %144 = vector.broadcast %cst_55 : f32 to vector<1x128xf32>
    %145 = arith.select %2, %143, %144 : vector<1x128xi1>, vector<1x128xf32>
    %cst_56 = arith.constant dense<0xFF800000> : vector<1xf32>
    %146 = vector.multi_reduction <maximumf>, %145, %cst_56 [1] : vector<1x128xf32> to vector<1xf32>
    %147 = vector.shape_cast %146 : vector<1xf32> to vector<1x1xf32>
    %148 = vector.broadcast %147 : vector<1x1xf32> to vector<1x128xf32>
    %149 = arith.subf %145, %148 : vector<1x128xf32>
    %150 = math.exp %149 : vector<1x128xf32>
    %cst_57 = arith.constant dense<0.000000e+00> : vector<1xf32>
    %151 = vector.multi_reduction <add>, %150, %cst_57 [1] : vector<1x128xf32> to vector<1xf32>
    %152 = vector.shape_cast %151 : vector<1xf32> to vector<1x1xf32>
    %153 = math.log %152 : vector<1x1xf32>
    %154 = vector.broadcast %153 : vector<1x1xf32> to vector<1x128xf32>
    %155 = arith.subf %149, %154 : vector<1x128xf32>
    %156 = arith.index_cast %c5_i32 : i32 to index
    %c0_58 = arith.constant 0 : index
    %c0_59 = arith.constant 0 : index
    %157 = vector.load %arg5[%156, %c0_58, %c0_59] : memref<6x1x128xf32, #tpu.memory_space<vmem>>, vector<1x1x128xf32>
    %158 = vector.shape_cast %157 : vector<1x1x128xf32> to vector<1x128xf32>
    %159 = vector.shape_cast %155 : vector<1x128xf32> to vector<1x1x128xf32>
    tpu.vector_store %arg5[%156, %c0_58, %c0_59], %159 {strides = array<i32>} : memref<6x1x128xf32, #tpu.memory_space<vmem>>, vector<1x1x128xf32>,
    %c6_i32 = arith.constant 6 : i32
    %c0_60 = arith.constant 0 : index
    %c0_61 = arith.constant 0 : index
    %160 = vector.load %arg6[%c0_60, %c0_61] : memref<1x128xf32, #tpu.memory_space<vmem>>, vector<1x128xf32>
    tpu.vector_store %arg6[%c0_60, %c0_61], %142 {strides = array<i32>} : memref<1x128xf32, #tpu.memory_space<vmem>>, vector<1x128xf32>,
    return
  }
  func.func @transform_0(%arg0: i32, %arg1: memref<6xi32, #tpu.memory_space<smem>>) -> (i32, i32) {
    %c0_i32 = arith.constant 0 : i32
    %c0_i32_0 = arith.constant 0 : i32
    %c0_i32_1 = arith.constant 0 : i32
    return %c0_i32, %c0_i32_0 : i32, i32
  }
  func.func @transform_1(%arg0: i32, %arg1: memref<6xi32, #tpu.memory_space<smem>>) -> (i32, i32, i32) {
    %c0_i32 = arith.constant 0 : i32
    %c0_i32_0 = arith.constant 0 : i32
    %c0_i32_1 = arith.constant 0 : i32
    %c0_i32_2 = arith.constant 0 : i32
    return %c0_i32, %c0_i32_0, %c0_i32_1 : i32, i32, i32
  }
  func.func @transform_2(%arg0: i32, %arg1: memref<6xi32, #tpu.memory_space<smem>>) -> (i32, i32) {
    %c0_i32 = arith.constant 0 : i32
    %c0_i32_0 = arith.constant 0 : i32
    %c0_i32_1 = arith.constant 0 : i32
    return %c0_i32, %c0_i32_0 : i32, i32
  }
  func.func @transform_3(%arg0: i32, %arg1: memref<6xi32, #tpu.memory_space<smem>>) -> (i32, i32, i32) {
    %c0_i32 = arith.constant 0 : i32
    %c0_i32_0 = arith.constant 0 : i32
    %c0_i32_1 = arith.constant 0 : i32
    %c0_i32_2 = arith.constant 0 : i32
    return %c0_i32, %c0_i32_0, %c0_i32_1 : i32, i32, i32
  }
  func.func @transform_4(%arg0: i32, %arg1: memref<6xi32, #tpu.memory_space<smem>>) -> (i32, i32) {
    %c0_i32 = arith.constant 0 : i32
    %c0_i32_0 = arith.constant 0 : i32
    %c0_i32_1 = arith.constant 0 : i32
    return %c0_i32, %c0_i32_0 : i32, i32
  }
}

</mosaic_0001>

<bundles_post_ra>
// kernel: tpu_custom_call.1
= control target key start
LH: loop header
LB: loop body
LE: loop exit
PB: predicated region body
PF: predicated region fallthrough
CT: control target
= control target key end

     0   :  { %s1628_s0 = inlined_call_operand.hbm [shape: s32[6], index: 0, kind: input, shape index: {}]   ;;  %s1629_s1 = inlined_call_operand.vmem [shape: f32[1,128], index: 1, kind: input, shape index: {}]   ;;  %s1630_s2 = inlined_call_operand.hbm [shape: f32[64,1,256], index: 2, kind: input, shape index: {}]   ;;  %s1631_s3 = inlined_call_operand.hbm [shape: f32[128,256], index: 3, kind: input, shape index: {}]   ;;  %s1632_s4 = inlined_call_operand.hbm [shape: f32[6,1,128], index: 4, kind: output, shape index: {0}]   ;;  %s1633_s5 = inlined_call_operand.hbm [shape: f32[1,128], index: 5, kind: output, shape index: {1}]  }
   0x1   :  { %s1221_s20 = scalar_lea.hbm %s1628_s0, 16 }
   0x2   :  { %p1222_p0 = scmp.ne.s32.totalorder %s1628_s0, %s1221_s20  ;;  %p1225_p1 = scmp.lt.u32.totalorder %s1221_s20, %s1628_s0 }
   0x4   :  { %p1227_p2 = pnand %p1225_p1, %p1222_p0 }
   0x6   :  { %1230 = shalt.err (!%p1227_p2)  }
   0x7   :  { %s1329_s25 = smov [#allocation3]  }
   0x8   :  { %12 = dma.hbm_to_smem %s1628_s0, 16, %s1329_s25, [#allocation2] }
   0x9   :  { %1319 = dma.done.wait [#allocation2], 16 }
   0xa   :  { %1320 = vsyncadd [#allocation2], 4294967280 }
   0xb   :  { %14 = sfence }
   0xc   :  { %15 = vsyncpa [#allocation5], 0 }
   0xd   :  { %16 = vsyncpa [#allocation8], 0 }
   0xe   :  { %17 = vsyncpa [#allocation6], 0 }
   0xf   :  { %18 = vsyncpa [#allocation11], 0  ;;  %s1330_s28 = smov [#allocation4]   ;;  %s1231_s7 = scalar_lea.hbm %s1630_s2, 2048 }
  0x10   :  { %s26_s29 = sshll.u32 %s1330_s28, 4  ;;  %p1232_p3 = scmp.ne.s32.totalorder %s1630_s2, %s1231_s7  ;;  %s27_s29 = int_to_ptr.vmem [resolvable:$true] %s26_s29 }
  0x11   :  { %p1235_p4 = scmp.lt.u32.totalorder %s1231_s7, %s1630_s2 }
  0x13   :  { %p1237_p5 = pnand %p1235_p4, %p1232_p3 }
  0x15   :  { %1240 = shalt.err (!%p1237_p5)
}
  0x16   :  { %s1241_s11 = scalar_lea.vmem %s27_s29, 2048  ;;  %p1246_p7 = scmp.lt.s32.totalorder %s27_s29, %s27_s29 }
  0x17   :  { %p1242_p6 = scmp.ne.s32.totalorder %s27_s29, %s1241_s11  ;;  %p1247_p8 = scmp.lt.s32.totalorder %s1241_s11, %s1241_s11 }
  0x19   :  { %p1248_p9 = por %p1247_p8, %p1246_p7 }
  0x1b   :  { %p1249_p10 = pnand %p1248_p9, %p1242_p6 }
  0x1d   :  { %1252 = shalt.err (!%p1249_p10)
}
  0x1e   :  { %s1331_s12 = smov 32   ;;  %s1332_s13 = smov 2  }
  0x1f   :  { %32 = dma.hbm_to_vmem [thread:$0]  %s1630_s2, 2048, %s27_s29, [#allocation5], %s1331_s12, %s1331_s12, %s1332_s13  }
  0x20   :  { %s1333_s16 = smov [#allocation7]   ;;  %s1253_s20 = scalar_lea.hbm %s1631_s3, 4096 }
  0x21   :  { %s38_s17 = sshll.u32 %s1333_s16, 4  ;;  %p1254_p11 = scmp.ne.s32.totalorder %s1631_s3, %s1253_s20  ;;  %s39_s17 = int_to_ptr.vmem [resolvable:$true] %s38_s17 }
  0x22   :  { %p1257_p12 = scmp.lt.u32.totalorder %s1253_s20, %s1631_s3 }
  0x24   :  { %p1259_p13 = pnand %p1257_p12, %p1254_p11 }
  0x26   :  { %1262 = shalt.err (!%p1259_p13)
}
  0x27   :  { %s1263_s25 = scalar_lea.vmem %s39_s17, 4096  ;;  %p1268_p1 = scmp.lt.s32.totalorder %s39_s17, %s39_s17 }
  0x28   :  { %p1264_p0 = scmp.ne.s32.totalorder %s39_s17, %s1263_s25  ;;  %p1269_p2 = scmp.lt.s32.totalorder %s1263_s25, %s1263_s25 }
  0x2a   :  { %p1270_p3 = por %p1269_p2, %p1268_p1 }
  0x2c   :  { %p1271_p4 = pnand %p1270_p3, %p1264_p0 }
  0x2e   :  { %1274 = shalt.err (!%p1271_p4)
}
  0x2f   :  { %s1334_s2 = smov 256   ;;  %s1335_s26 = smov 16  }
  0x30   :  { %44 = dma.hbm_to_vmem [thread:$0]  %s1631_s3, 4096, %s39_s17, [#allocation8], %s1334_s2, %s1334_s2, %s1335_s26  }
  0x31   :  { %1321 = dma.done.wait [#allocation5], 2048  }
  0x32   :  { %1322 = vsyncadd [#allocation5], 4294965248 }
  0x33   :  { %1323 = dma.done.wait [#allocation8], 4096  }
  0x34   :  { %1324 = vsyncadd [#allocation8], 4294963200  ;;  %v1336_v0 = vmov 0.0   ;;  %v60_v1 = vld [vmem:[#allocation7 + $0x8] sm:$0xff]  ;;  %v62_v2 = vld [vmem:[#allocation7 + $0x18] sm:$0xff]  ;;  %v51_v50 = vlaneseq  ;;  %vm188_vm1 = vcmask 1040384  }
  0x35   :  { %155 = vmatprep.mubr.f32.mxu0 %v1336_v0  ;;  %302 = vmatprep.mubr.f32.mxu1 %v1336_v0  ;;  %v59_v3 = vld [vmem:[#allocation7] sm:$0xff]  ;;  %v1410_v4 = vpack.c.bf16 %v62_v2, %v60_v1  ;;  %v61_v5 = vld [vmem:[#allocation7 + $0x10] sm:$0xff]  ;;  %v64_v6 = vld [vmem:[#allocation7 + $0x28] sm:$0xff]  ;;  %v1337_v51 = vmov 1966171168   ;;  %s983_s7 = sld [smem:[#allocation3 + $0x1]] }
  0x36   :  { %v66_v7 = vld [vmem:[#allocation7 + $0x38] sm:$0xff]  ;;  %v1412_v8 = vpack.c.bf16 %v61_v5, %v59_v3  ;;  %v63_v10 = vld [vmem:[#allocation7 + $0x20] sm:$0xff]  ;;  %v65_v11 = vld [vmem:[#allocation7 + $0x30] sm:$0xff]  ;;  %v166_v52 = vunpack.c.l.s4 %v1337_v51  ;;  %v169_v54 = vshrl.u32 %v51_v50, 7  ;;  %v1499_v61 = vand.u32 127, %v51_v50  ;;  %s985_s10 = sld [smem:[#allocation3 + $0x2]] }
  0x37   :  { %v1414_v9 = vpack.c.bf16 %v66_v7, %v64_v6  ;;  %v68_v12 = vld [vmem:[#allocation7 + $0x48] sm:$0xff]  ;;  %994 = vmatprep.subr.bf16.mxu0 %v1410_v4  ;;  %v70_v13 = vld [vmem:[#allocation7 + $0x58] sm:$0xff]  ;;  %1026 = vmatprep.subr.bf16.mxu1 %v1410_v4  ;;  %v1419_v14 = vpack.c.bf16 %v65_v11, %v63_v10  ;;  %v67_v16 = vld [vmem:[#allocation7 + $0x40] sm:$0xff]  ;;  %s987_s12 = sld [smem:[#allocation3 + $0x3]]  ;;  %s989_s15 = sld [smem:[#allocation3 + $0x4]] }
  0x38   :  { %996 = vmatpush1.bf16.msra.mxu0 %v1412_v8  ;;  %1028 = vmatpush1.bf16.msra.mxu1 %v1412_v8  ;;  %v1423_v15 = vpack.c.bf16 %v70_v13, %v68_v12  ;;  %v69_v17 = vld [vmem:[#allocation7 + $0x50] sm:$0xff]  ;;  %v72_v18 = vld [vmem:[#allocation7 + $0x68] sm:$0xff]  ;;  %v74_v19 = vld [vmem:[#allocation7 + $0x78] sm:$0xff]  ;;  %v167_v53 = vunpack.c.0.s8 %v166_v52  ;;  %v1502_v63 = vsub.s32 1, %v169_v54  ;;  %vm53_vm0 = vcmp.lt.s32.totalorder %v1499_v61, 18  ;;  %s991_s18 = sld [smem:[#allocation3 + $0x5]] }
  0x39   :  { %998 = vmatprep.subr.bf16.mxu0 %v1414_v9  ;;  %1030 = vmatprep.subr.bf16.mxu1 %v1414_v9  ;;  %v1427_v20 = vpack.c.bf16 %v69_v17, %v67_v16  ;;  %v1431_v21 = vpack.c.bf16 %v74_v19, %v72_v18  ;;  %v71_v22 = vld [vmem:[#allocation7 + $0x60] sm:$0xff]  ;;  %v73_v23 = vld [vmem:[#allocation7 + $0x70] sm:$0xff]  ;;  %v76_v24 = vld [vmem:[#allocation7 + $0x88] sm:$0xff]  ;;  %s1338_s21 = smov [#allocation10]  }
  0x3a   :  { %v78_v25 = vld [vmem:[#allocation7 + $0x98] sm:$0xff]  ;;  %v1435_v26 = vpack.c.bf16 %v73_v23, %v71_v22  ;;  %v75_v28 = vld [vmem:[#allocation7 + $0x80] sm:$0xff]  ;;  %v77_v29 = vld [vmem:[#allocation7 + $0x90] sm:$0xff]  ;;  %v1496_v56 = vsub.s32 %v167_v53, %v169_v54  ;;  %s956_s22 = sshll.u32 %s1338_s21, 4  ;;  %s957_s22 = int_to_ptr.vmem [resolvable:$true] %s956_s22 }
  0x3b   :  { %v1439_v27 = vpack.c.bf16 %v78_v25, %v76_v24  ;;  %v80_v30 = vld [vmem:[#allocation7 + $0xa8] sm:$0xff]  ;;  %v82_v31 = vld [vmem:[#allocation7 + $0xb8] sm:$0xff]  ;;  %v1443_v32 = vpack.c.bf16 %v77_v29, %v75_v28  ;;  %v79_v34 = vld [vmem:[#allocation7 + $0xa0] sm:$0xff]  ;;  %s984_s8 = sshll.u32 %s983_s7, 1  ;;  %s1275_s23 = scalar_lea.vmem %s957_s22, 16 }
  0x3c   :  { %1000 = vmatpush1.bf16.msra.mxu0 %v1419_v14  ;;  %1032 = vmatpush1.bf16.msra.mxu1 %v1419_v14  ;;  %v1447_v33 = vpack.c.bf16 %v82_v31, %v80_v30  ;;  %v81_v35 = vld [vmem:[#allocation7 + $0xb0] sm:$0xff]  ;;  %v84_v36 = vld [vmem:[#allocation7 + $0xc8] sm:$0xff]  ;;  %v86_v37 = vld [vmem:[#allocation7 + $0xd8] sm:$0xff]  ;;  %s204_s9 = scalar_lea.vmem [#allocation4], %s984_s8  ;;  %s986_s0 = sshll.u32 %s985_s10, 1 }
  0x3d   :  { %1002 = vmatprep.subr.bf16.mxu0 %v1423_v15  ;;  %1034 = vmatprep.subr.bf16.mxu1 %v1423_v15  ;;  %v1451_v38 = vpack.c.bf16 %v81_v35, %v79_v34  ;;  %v1455_v39 = vpack.c.bf16 %v86_v37, %v84_v36  ;;  %v83_v40 = vld [vmem:[#allocation7 + $0xc0] sm:$0xff]  ;;  %v85_v41 = vld [vmem:[#allocation7 + $0xd0] sm:$0xff]  ;;  %v88_v42 = vld [vmem:[#allocation7 + $0xe8] sm:$0xff]  ;;  %s351_s11 = scalar_lea.vmem [#allocation4], %s986_s0  ;;  %s988_s13 = sshll.u32 %s987_s12, 1 }
  0x3e   :  { %v90_v43 = vld [vmem:[#allocation7 + $0xf8] sm:$0xff]  ;;  %v1459_v44 = vpack.c.bf16 %v85_v41, %v83_v40  ;;  %v87_v46 = vld [vmem:[#allocation7 + $0xe0] sm:$0xff]  ;;  %v89_v47 = vld [vmem:[#allocation7 + $0xf0] sm:$0xff]  ;;  %s498_s14 = scalar_lea.vmem [#allocation4], %s988_s13  ;;  %s990_s16 = sshll.u32 %s989_s15, 1 }
  0x3f   :  { %v1463_v45 = vpack.c.bf16 %v90_v43, %v88_v42  ;;  %v1467_v48 = vpack.c.bf16 %v89_v47, %v87_v46  ;;  %v54_v49 = vld [vmem:[%s1629_s1] sm:$0x1]  ;;  %s55_s1 = sld [smem:[#allocation3]]  ;;  %s645_s17 = scalar_lea.vmem [#allocation4], %s990_s16 }
  0x40   :  { %1004 = vmatpush1.bf16.msra.mxu0 %v1427_v20  ;;  %1036 = vmatpush1.bf16.msra.mxu1 %v1427_v20  ;;  %v205_v12 = vld [vmem:[%s204_s9] sm:$0x3]  ;;  %s992_s19 = sshll.u32 %s991_s18, 1  ;;  %p1276_p5 = scmp.ne.s32.totalorder %s957_s22, %s1275_s23 }
  0x41   :  { %1006 = vmatprep.subr.bf16.mxu0 %v1431_v21  ;;  %1038 = vmatprep.subr.bf16.mxu1 %v1431_v21  ;;  %v352_v25 = vld [vmem:[%s351_s11] sm:$0x3]  ;;  %s792_s20 = scalar_lea.vmem [#allocation4], %s992_s19  ;;  %s1279_s24 = scalar_lea.vmem %s957_s22, 32 }
  0x42   :  { %p1280_p6 = scmp.lt.s32.totalorder %s957_s22, %s957_s22  ;;  %p1281_p7 = scmp.lt.s32.totalorder %s1279_s24, %s1275_s23 }
  0x44   :  { %1008 = vmatpush1.bf16.msra.mxu0 %v1435_v26  ;;  %1040 = vmatpush1.bf16.msra.mxu1 %v1435_v26  ;;  %p1282_p8 = por %p1281_p7, %p1280_p6 }
  0x45   :  { %1010 = vmatprep.subr.bf16.mxu0 %v1439_v27  ;;  %1042 = vmatprep.subr.bf16.mxu1 %v1439_v27  ;;  %s982_s30 = sshll.u32 %s55_s1, 1 }
  0x46   :  { %s57_s6 = scalar_lea.vmem [#allocation4], %s982_s30  ;;  %p1283_p9 = pnand %p1282_p8, %p1276_p5 }
  0x47   :  { %v58_v60 = vld [vmem:[%s57_s6] sm:$0x3] }
  0x48   :  { %1012 = vmatpush1.bf16.msra.mxu0 %v1443_v32  ;;  %1044 = vmatpush1.bf16.msra.mxu1 %v1443_v32 }
  0x49   :  { %1014 = vmatprep.subr.bf16.mxu0 %v1447_v33  ;;  %1046 = vmatprep.subr.bf16.mxu1 %v1447_v33 }
  0x4c   :  { %1016 = vmatpush1.bf16.msra.mxu0 %v1451_v38  ;;  %1048 = vmatpush1.bf16.msra.mxu1 %v1451_v38 }
  0x4d   :  { %1018 = vmatprep.subr.bf16.mxu0 %v1455_v39  ;;  %1050 = vmatprep.subr.bf16.mxu1 %v1455_v39 }
  0x50   :  { %1020 = vmatpush1.bf16.msra.mxu0 %v1459_v44  ;;  %1052 = vmatpush1.bf16.msra.mxu1 %v1459_v44 }
  0x51   :  { %1022 = vmatprep.subr.bf16.mxu0 %v1463_v45  ;;  %1054 = vmatprep.subr.bf16.mxu1 %v1463_v45 }
  0x54   :  { %1024 = vmatpush1.bf16.msra.mxu0 %v1467_v48  ;;  %1056 = vmatpush1.bf16.msra.mxu1 %v1467_v48 }
  0x55   :  { %1058 = vmatprep.subr.bf16.mxu0 %v1410_v4  ;;  %1090 = vmatprep.subr.bf16.mxu1 %v1410_v4 }
  0x57   :  { %156 = vmatmul.mubr.f32.vlgmr.msra.gmra.mrb[0].mxu0 %v54_v49 }
  0x58   :  { %1060 = vmatpush1.bf16.msra.mxu0 %v1412_v8  ;;  %449 = vmatprep.mubr.f32.mxu0 %v1336_v0 }
  0x59   :  { %1062 = vmatprep.subr.bf16.mxu0 %v1414_v9 }
  0x5c   :  { %1064 = vmatpush1.bf16.msra.mxu0 %v1419_v14 }
  0x5d   :  { %1066 = vmatprep.subr.bf16.mxu0 %v1423_v15 }
  0x60   :  { %1068 = vmatpush1.bf16.msra.mxu0 %v1427_v20 }
  0x61   :  { %1070 = vmatprep.subr.bf16.mxu0 %v1431_v21 }
  0x64   :  { %1072 = vmatpush1.bf16.msra.mxu0 %v1435_v26 }
  0x65   :  { %1074 = vmatprep.subr.bf16.mxu0 %v1439_v27 }
  0x68   :  { %1076 = vmatpush1.bf16.msra.mxu0 %v1443_v32 }
  0x69   :  { %1078 = vmatprep.subr.bf16.mxu0 %v1447_v33 }
  0x6c   :  { %1080 = vmatpush1.bf16.msra.mxu0 %v1451_v38 }
  0x6d   :  { %1082 = vmatprep.subr.bf16.mxu0 %v1455_v39 }
  0x70   :  { %1084 = vmatpush1.bf16.msra.mxu0 %v1459_v44 }
  0x71   :  { %1086 = vmatprep.subr.bf16.mxu0 %v1463_v45 }
  0x74   :  { %1088 = vmatpush1.bf16.msra.mxu0 %v1467_v48 }
  0x75   :  { %1122 = vmatprep.subr.bf16.mxu0 %v1410_v4 }
 0x12a   :  { %v157_v55 = vpop.f32.mrb[0].mxu0 }
 0x12b   :  { %v159_v57 = vpop.f32.mrb[1].mxu0 }
 0x12c   :  { %v164_v58 = vcombine.low %v157_v55, %v159_v57 }
 0x12e   :  { %v171_v59 = vrot.slane %v164_v58, %v1496_v56 }
 0x130   :  { %v178_v62 = vrot.slane %v171_v59, %v1496_v56 }
 0x132   :  { %v180_v1 = vadd.f32 %v178_v62, %v58_v60 }
 0x134   :  { %303 = vmatmul.mubr.f32.vlgmr.msra.gmra.mrb[0].mxu1 %v180_v1  ;;  %v185_v2 = vrot.slane %v180_v1, %v1502_v63 }
 0x135   :  { %1092 = vmatpush1.bf16.msra.mxu1 %v1412_v8  ;;  %596 = vmatprep.mubr.f32.mxu1 %v1336_v0 }
 0x136   :  { %v1510_v3 = vsel %vm53_vm0, %v185_v2, -inf  ;;  %1094 = vmatprep.subr.bf16.mxu1 %v1414_v9 }
 0x137   :  { %v189_v5 = vsel %vm188_vm1, %v1510_v3, -inf }
 0x138   :  { %190 = vmax.xlane.f32.xlu0 %v189_v5 }
 0x139   :  { %1096 = vmatpush1.bf16.msra.mxu1 %v1419_v14 }
 0x13a   :  { %1098 = vmatprep.subr.bf16.mxu1 %v1423_v15 }
 0x13d   :  { %1100 = vmatpush1.bf16.msra.mxu1 %v1427_v20 }
 0x13e   :  { %1102 = vmatprep.subr.bf16.mxu1 %v1431_v21 }
 0x141   :  { %1104 = vmatpush1.bf16.msra.mxu1 %v1435_v26 }
 0x142   :  { %1106 = vmatprep.subr.bf16.mxu1 %v1439_v27 }
 0x145   :  { %1108 = vmatpush1.bf16.msra.mxu1 %v1443_v32 }
 0x146   :  { %1110 = vmatprep.subr.bf16.mxu1 %v1447_v33 }
 0x149   :  { %1112 = vmatpush1.bf16.msra.mxu1 %v1451_v38 }
 0x14a   :  { %1114 = vmatprep.subr.bf16.mxu1 %v1455_v39 }
 0x14d   :  { %1116 = vmatpush1.bf16.msra.mxu1 %v1459_v44 }
 0x14e   :  { %1118 = vmatprep.subr.bf16.mxu1 %v1463_v45 }
 0x151   :  { %1120 = vmatpush1.bf16.msra.mxu1 %v1467_v48 }
 0x152   :  { %1154 = vmatprep.subr.bf16.mxu1 %v1410_v4 }
 0x207   :  { %v304_v6 = vpop.f32.mrb[0].mxu1 }
 0x208   :  { %v306_v7 = vpop.f32.mrb[1].mxu1 }
 0x209   :  { %v311_v10 = vcombine.low %v304_v6, %v306_v7 }
 0x20b   :  { %v318_v11 = vrot.slane %v311_v10, %v1496_v56 }
 0x20d   :  { %v325_v13 = vrot.slane %v318_v11, %v1496_v56 }
 0x20f   :  { %v327_v16 = vadd.f32 %v325_v13, %v205_v12 }
 0x211   :  { %450 = vmatmul.mubr.f32.vlgmr.msra.gmra.mrb[2].mxu0 %v327_v16  ;;  %v332_v17 = vrot.slane %v327_v16, %v1502_v63 }
 0x212   :  { %1124 = vmatpush1.bf16.msra.mxu0 %v1412_v8  ;;  %743 = vmatprep.mubr.f32.mxu0 %v1336_v0 }
 0x213   :  { %v1536_v4 = vsel %vm53_vm0, %v332_v17, -inf  ;;  %1126 = vmatprep.subr.bf16.mxu0 %v1414_v9 }
 0x214   :  { %v335_v18 = vsel %vm188_vm1, %v1536_v4, -inf }
 0x215   :  { %336 = vmax.xlane.f32.xlu0 %v335_v18 }
 0x216   :  { %1128 = vmatpush1.bf16.msra.mxu0 %v1419_v14 }
 0x217   :  { %1130 = vmatprep.subr.bf16.mxu0 %v1423_v15 }
 0x21a   :  { %1132 = vmatpush1.bf16.msra.mxu0 %v1427_v20 }
 0x21b   :  { %1134 = vmatprep.subr.bf16.mxu0 %v1431_v21 }
 0x21e   :  { %1136 = vmatpush1.bf16.msra.mxu0 %v1435_v26 }
 0x21f   :  { %1138 = vmatprep.subr.bf16.mxu0 %v1439_v27 }
 0x222   :  { %1140 = vmatpush1.bf16.msra.mxu0 %v1443_v32 }
 0x223   :  { %1142 = vmatprep.subr.bf16.mxu0 %v1447_v33 }
 0x226   :  { %1144 = vmatpush1.bf16.msra.mxu0 %v1451_v38 }
 0x227   :  { %1146 = vmatprep.subr.bf16.mxu0 %v1455_v39 }
 0x22a   :  { %1148 = vmatpush1.bf16.msra.mxu0 %v1459_v44 }
 0x22b   :  { %1150 = vmatprep.subr.bf16.mxu0 %v1463_v45 }
 0x22e   :  { %1152 = vmatpush1.bf16.msra.mxu0 %v1467_v48 }
 0x2e4   :  { %v451_v19 = vpop.f32.mrb[2].mxu0 }
 0x2e5   :  { %v453_v22 = vpop.f32.mrb[3].mxu0 }
 0x2e6   :  { %v458_v23 = vcombine.low %v451_v19, %v453_v22 }
 0x2e8   :  { %v465_v24 = vrot.slane %v458_v23, %v1496_v56 }
 0x2ea   :  { %v472_v28 = vrot.slane %v465_v24, %v1496_v56  ;;  %v793_v24 = vld [vmem:[%s792_s20] sm:$0x3] }
 0x2ec   :  { %v474_v29 = vadd.f32 %v472_v28, %v352_v25 }
 0x2ee   :  { %597 = vmatmul.mubr.f32.vlgmr.msra.gmra.mrb[2].mxu1 %v474_v29  ;;  %v479_v30 = vrot.slane %v474_v29, %v1502_v63 }
 0x2ef   :  { %1156 = vmatpush1.bf16.msra.mxu1 %v1412_v8  ;;  %890 = vmatprep.mubr.f32.mxu1 %v1336_v0 }
 0x2f0   :  { %v481_v31 = vsel %vm53_vm0, %v479_v30, -inf  ;;  %1158 = vmatprep.subr.bf16.mxu1 %v1414_v9 }
 0x2f1   :  { %v482_v34 = vsel %vm188_vm1, %v481_v31, -inf }
 0x2f2   :  { %483 = vmax.xlane.f32.xlu1 %v482_v34 }
 0x2f3   :  { %1160 = vmatpush1.bf16.msra.mxu1 %v1419_v14 }
 0x2f4   :  { %1162 = vmatprep.subr.bf16.mxu1 %v1423_v15  ;;  %v499_v15 = vld [vmem:[%s498_s14] sm:$0x3] }
 0x2f7   :  { %1164 = vmatpush1.bf16.msra.mxu1 %v1427_v20 }
 0x2f8   :  { %1166 = vmatprep.subr.bf16.mxu1 %v1431_v21 }
 0x2fb   :  { %1168 = vmatpush1.bf16.msra.mxu1 %v1435_v26 }
 0x2fc   :  { %1170 = vmatprep.subr.bf16.mxu1 %v1439_v27 }
 0x2ff   :  { %1172 = vmatpush1.bf16.msra.mxu1 %v1443_v32 }
 0x300   :  { %1174 = vmatprep.subr.bf16.mxu1 %v1447_v33  ;;  %v191_v33 = vpop.xlane.xlu0 %190 }
 0x301   :  { %v192_v35 = vsub.f32 %v1510_v3, %v191_v33 }
 0x303   :  { %1176 = vmatpush1.bf16.msra.mxu1 %v1451_v38  ;;  %v193_v37 = vmul.f32 1.442695, %v192_v35 }
 0x304   :  { %1178 = vmatprep.subr.bf16.mxu1 %v1455_v39  ;;  %v337_v54 = vpop.xlane.xlu0 %336 }
 0x305   :  { %1197 = vpow2.f32 %v193_v37  ;;  %v338_v11 = vsub.f32 %v1536_v4, %v337_v54 }
 0x307   :  { %1180 = vmatpush1.bf16.msra.mxu1 %v1459_v44  ;;  %v646_v44 = vld [vmem:[%s645_s17] sm:$0x3]  ;;  %v339_v13 = vmul.f32 1.442695, %v338_v11 }
 0x308   :  { %1182 = vmatprep.subr.bf16.mxu1 %v1463_v45 }
 0x30b   :  { %1184 = vmatpush1.bf16.msra.mxu1 %v1467_v48 }
 0x30f   :  { %v1198_v50 = vpop.eup %1197 }
 0x310   :  { %v195_v51 = vsel %vm188_vm1, %v1198_v50, 0.0 }
 0x37f   :  { %v484_v36 = vpop.xlane.xlu1 %483 }
 0x380   :  { %v485_v38 = vsub.f32 %v481_v31, %v484_v36 }
 0x382   :  { %v486_v42 = vmul.f32 1.442695, %v485_v38 }
 0x384   :  { %1199 = vpow2.f32 %v486_v42 }
 0x38e   :  { %v1200_v52 = vpop.eup %1199 }
 0x38f   :  { %v488_v53 = vsel %vm188_vm1, %v1200_v52, 0.0 }
 0x3c1   :  { %v598_v0 = vpop.f32.mrb[2].mxu1 }
 0x3c2   :  { %v600_v8 = vpop.f32.mrb[3].mxu1 }
 0x3c3   :  { %v605_v9 = vcombine.low %v598_v0, %v600_v8 }
 0x3c5   :  { %v612_v14 = vrot.slane %v605_v9, %v1496_v56 }
 0x3c7   :  { %v619_v20 = vrot.slane %v612_v14, %v1496_v56 }
 0x3c9   :  { %v621_v21 = vadd.f32 %v619_v20, %v499_v15 }
 0x3cb   :  { %744 = vmatmul.mubr.f32.vlgmr.msra.gmra.mrb[4].mxu0 %v621_v21  ;;  %v626_v26 = vrot.slane %v621_v21, %v1502_v63 }
 0x3cd   :  { %v628_v27 = vsel %vm53_vm0, %v626_v26, -inf }
 0x3ce   :  { %v629_v32 = vsel %vm188_vm1, %v628_v27, -inf }
 0x3cf   :  { %630 = vmax.xlane.f32.xlu1 %v629_v32 }
 0x45c   :  { %v631_v12 = vpop.xlane.xlu1 %630 }
 0x45d   :  { %v632_v16 = vsub.f32 %v628_v27, %v631_v12 }
 0x45f   :  { %v633_v22 = vmul.f32 1.442695, %v632_v16 }
 0x49e   :  { %v745_v39 = vpop.f32.mrb[4].mxu0 }
 0x49f   :  { %v747_v40 = vpop.f32.mrb[5].mxu0 }
 0x4a0   :  { %v752_v41 = vcombine.low %v745_v39, %v747_v40 }
 0x4a2   :  { %v759_v43 = vrot.slane %v752_v41, %v1496_v56 }
 0x4a4   :  { %v766_v45 = vrot.slane %v759_v43, %v1496_v56 }
 0x4a6   :  { %v768_v46 = vadd.f32 %v766_v45, %v646_v44 }
 0x4a8   :  { %891 = vmatmul.mubr.f32.vlgmr.msra.gmra.mrb[4].mxu1 %v768_v46  ;;  %v773_v47 = vrot.slane %v768_v46, %v1502_v63 }
 0x4aa   :  { %v775_v48 = vsel %vm53_vm0, %v773_v47, -inf }
 0x4ab   :  { %v776_v49 = vsel %vm188_vm1, %v775_v48, -inf }
 0x4ac   :  { %777 = vmax.xlane.f32.xlu0 %v776_v49 }
 0x4b0   :  { %196 = vadd.xlane.f32.xlu0 %v195_v51 }
 0x4b4   :  { %489 = vadd.xlane.f32.xlu0 %v488_v53 }
 0x539   :  { %v778_v55 = vpop.xlane.xlu0 %777 }
 0x53a   :  { %v779_v57 = vsub.f32 %v775_v48, %v778_v55 }
 0x53c   :  { %v780_v58 = vmul.f32 1.442695, %v779_v57 }
 0x53d   :  { %v197_v59 = vpop.xlane.xlu0 %196 }
 0x53e   :  { %1201 = vpow2.f32 %v780_v58 }
 0x53f   :  { %1203 = vlog2.f32 %v197_v59 }
 0x541   :  { %v490_v60 = vpop.xlane.xlu0 %489 }
 0x542   :  { %1205 = vlog2.f32 %v490_v60 }
 0x543   :  { %1207 = vpow2.f32 %v339_v13 }
 0x544   :  { %1209 = vpow2.f32 %v633_v22 }
 0x548   :  { %v1202_v62 = vpop.eup %1201 }
 0x549   :  { %v1204_v1 = vpop.eup %1203  ;;  %v782_v2 = vsel %vm188_vm1, %v1202_v62, 0.0 }
 0x54a   :  { %v199_v3 = vmul.f32 0.6931472, %v1204_v1  ;;  %783 = vadd.xlane.f32.xlu0 %v782_v2 }
 0x54c   :  { %v1206_v5 = vpop.eup %1205  ;;  %v200_v6 = vsub.f32 %v192_v35, %v199_v3 }
 0x54d   :  { %v492_v7 = vmul.f32 0.6931472, %v1206_v5  ;;  %v1208_v31 = vpop.eup %1207 }
 0x54e   :  { %201 = vst [vmem:[#allocation9] sm:$0x1] %v200_v6  ;;  %v341_v34 = vsel %vm188_vm1, %v1208_v31, 0.0  ;;  %v1210_v0 = vpop.eup %1209 }
 0x54f   :  { %v493_v10 = vsub.f32 %v485_v38, %v492_v7  ;;  %v635_v8 = vsel %vm188_vm1, %v1210_v0, 0.0 }
 0x551   :  { %495 = vst [vmem:[#allocation9 + $0x2] sm:$0x1] %v493_v10 }
 0x57b   :  { %v892_v17 = vpop.f32.mrb[4].mxu1 }
 0x57c   :  { %v894_v18 = vpop.f32.mrb[5].mxu1 }
 0x57d   :  { %v899_v19 = vcombine.low %v892_v17, %v894_v18 }
 0x57f   :  { %v906_v23 = vrot.slane %v899_v19, %v1496_v56 }
 0x581   :  { %v913_v25 = vrot.slane %v906_v23, %v1496_v56 }
 0x583   :  { %v915_v28 = vadd.f32 %v913_v25, %v793_v24 }
 0x585   :  { %v920_v29 = vrot.slane %v915_v28, %v1502_v63  ;;  %937 = vst [vmem:[#allocation10] sm:$0x1] %v915_v28 }
 0x587   :  { %v922_v4 = vsel %vm53_vm0, %v920_v29, -inf }
 0x588   :  { %v923_v30 = vsel %vm188_vm1, %v922_v4, -inf }
 0x589   :  { %924 = vmax.xlane.f32.xlu1 %v923_v30 }
 0x58d   :  { %342 = vadd.xlane.f32.xlu1 %v341_v34 }
 0x591   :  { %636 = vadd.xlane.f32.xlu1 %v635_v8 }
 0x5d7   :  { %v784_v56 = vpop.xlane.xlu0 %783 }
 0x5d8   :  { %1211 = vlog2.f32 %v784_v56 }
 0x5e2   :  { %v1212_v9 = vpop.eup %1211 }
 0x5e3   :  { %v786_v14 = vmul.f32 0.6931472, %v1212_v9 }
 0x5e5   :  { %v787_v63 = vsub.f32 %v779_v57, %v786_v14 }
 0x5e7   :  { %789 = vst [vmem:[#allocation9 + $0x4] sm:$0x1] %v787_v63 }
 0x616   :  { %v925_v15 = vpop.xlane.xlu1 %924 }
 0x617   :  { %v926_v61 = vsub.f32 %v922_v4, %v925_v15 }
 0x619   :  { %v927_v20 = vmul.f32 1.442695, %v926_v61 }
 0x61a   :  { %v343_v21 = vpop.xlane.xlu1 %342 }
 0x61b   :  { %1213 = vpow2.f32 %v927_v20 }
 0x61c   :  { %1215 = vlog2.f32 %v343_v21 }
 0x61e   :  { %v637_v26 = vpop.xlane.xlu1 %636 }
 0x61f   :  { %1217 = vlog2.f32 %v637_v26 }
 0x625   :  { %v1214_v27 = vpop.eup %1213 }
 0x626   :  { %v1216_v32 = vpop.eup %1215  ;;  %v929_v33 = vsel %vm188_vm1, %v1214_v27, 0.0 }
 0x627   :  { %v345_v35 = vmul.f32 0.6931472, %v1216_v32  ;;  %930 = vadd.xlane.f32.xlu1 %v929_v33 }
 0x629   :  { %v1218_v36 = vpop.eup %1217  ;;  %v346_v37 = vsub.f32 %v338_v11, %v345_v35 }
 0x62a   :  { %v639_v38 = vmul.f32 0.6931472, %v1218_v36 }
 0x62b   :  { %348 = vst [vmem:[#allocation9 + $0x1] sm:$0x1] %v346_v37 }
 0x62c   :  { %v640_v39 = vsub.f32 %v632_v16, %v639_v38 }
 0x62e   :  { %642 = vst [vmem:[#allocation9 + $0x3] sm:$0x1] %v640_v39 }
 0x62f   :  { %1286 = shalt.err (!%p1283_p9)
}
 0x630   :  { %s1287_s27 = scalar_lea.hbm %s1633_s5, 16 }
 0x631   :  { %p1288_p10 = scmp.ne.s32.totalorder %s1633_s5, %s1287_s27  ;;  %p1291_p11 = scmp.lt.u32.totalorder %s1287_s27, %s1633_s5 }
 0x633   :  { %p1293_p12 = pnand %p1291_p11, %p1288_p10 }
 0x635   :  { %1296 = shalt.err (!%p1293_p12)
}
 0x636   :  { %959 = dma.vmem_to_hbm [thread:$0]  %s957_s22, 16, %s1633_s5, [#allocation11]  }
 0x637   :  { %s1339_s7 = smov [#allocation9]  }
 0x638   :  { %s943_s8 = sshll.u32 %s1339_s7, 4  ;;  %s944_s8 = int_to_ptr.vmem [resolvable:$true] %s943_s8 }
 0x639   :  { %s1297_s9 = scalar_lea.vmem %s944_s8, 96  ;;  %p1302_p0 = scmp.lt.s32.totalorder %s944_s8, %s944_s8 }
 0x63a   :  { %p1298_p13 = scmp.ne.s32.totalorder %s944_s8, %s1297_s9  ;;  %p1303_p1 = scmp.lt.s32.totalorder %s1297_s9, %s1297_s9 }
 0x63c   :  { %p1304_p2 = por %p1303_p1, %p1302_p0 }
 0x63e   :  { %p1305_p3 = pnand %p1304_p2, %p1298_p13 }
 0x6b4   :  { %v931_v40 = vpop.xlane.xlu1 %930 }
 0x6b5   :  { %1219 = vlog2.f32 %v931_v40 }
 0x6bf   :  { %v1220_v41 = vpop.eup %1219 }
 0x6c0   :  { %v933_v42 = vmul.f32 0.6931472, %v1220_v41 }
 0x6c2   :  { %v934_v43 = vsub.f32 %v926_v61, %v933_v42 }
 0x6c4   :  { %936 = vst [vmem:[#allocation9 + $0x5] sm:$0x1] %v934_v43 }
 0x6c5   :  { %1308 = shalt.err (!%p1305_p3)
}
 0x6c6   :  { %s1309_s5 = scalar_lea.hbm %s1632_s4, 96 }
 0x6c7   :  { %p1310_p4 = scmp.ne.s32.totalorder %s1632_s4, %s1309_s5  ;;  %p1313_p5 = scmp.lt.u32.totalorder %s1309_s5, %s1632_s4 }
 0x6c9   :  { %p1315_p6 = pnand %p1313_p5, %p1310_p4 }
 0x6cb   :  { %1318 = shalt.err (!%p1315_p6)
}
 0x6cc   :  { %s1340_s15 = smov 1  }
 0x6cd   :  { %949 = dma.vmem_to_hbm [thread:$0]  %s944_s8, 96, %s1632_s4, [#allocation6], %s1335_s26, %s1335_s26, %s1340_s15  }
 0x6ce   :  { %1325 = dma.done.wait [#allocation6], 96  }
 0x6cf   :  { %1326 = vsyncadd [#allocation6], 4294967200 }
 0x6d0   :  { %1327 = dma.done.wait [#allocation11], 16  }
 0x6d1   :  { %1328 = vsyncadd [#allocation11], 4294967280 }
 0x6d2   :  { %966 = vsyncpa [#allocation5], 1 }
 0x6d3   :  { %967 = vsyncpa [#allocation8], 1 }
 0x6d4   :  { %968 = vsyncpa [#allocation6], 1 }
 0x6d5   :  { %969 = vsyncpa [#allocation11], 1 }

</bundles_post_ra>
